<compile_context>
chip_gen: v7x
topology: tpu7x:2x2x1
jax: 0.10.0
libtpu: 0.0.40
codegen_flags: <defaults>
</compile_context>

<pallas_src>
import math
from functools import partial

import jax
import jax.numpy as jnp
from jax.experimental import pallas as pl
from jax.experimental.pallas import tpu as pltpu


def _round_up(x, m):
    return ((x + m - 1) // m) * m


# ----------------------------- Pallas kernel -------------------------------

def _spectral_matmul_kernel(xs_ref, ws_ref, o_ref):
    # xs: (MT, Bp, Kp)  bf16, last dim = [Re(x_ft) | Im(x_ft)] over channels (zero padded)
    # ws: (MT, Kp, Np)  bf16, real-block form [[Wr, Wi], [-Wi, Wr]] (zero padded)
    # o : (MT, Bp, Np)  f32,  last dim = [Re(out_ft) | Im(out_ft)]
    # One stacked matmul per mode performs the full complex channel mixing:
    # pure MXU work + unmasked, lane-dense stores (no epilogue).
    o_ref[...] = jnp.einsum('mbk,mkn->mbn', xs_ref[...], ws_ref[...],
                            preferred_element_type=jnp.float32)


def _default_vmem_limit_bytes():
    # Per-generation VMEM budget: ~45 MiB on v7x (64 MiB physical per TC),
    # ~90 MiB on v5e / v6e (128 MiB physical).
    try:
        cap = int(pltpu.get_tpu_info().vmem_capacity_bytes)
    except Exception:
        cap = 128 << 20
    return max(32 << 20, min(int(cap * 0.70), 100 << 20))


def _choose_mode_tile(M, b_pad, k_pad, n_pad, vmem_limit_bytes):
    # Double-buffered per-mode working set: bf16 inputs + f32 output.
    per_mode = 2 * (2 * b_pad * k_pad + 2 * k_pad * n_pad + 4 * b_pad * n_pad)
    budget = vmem_limit_bytes // 2               # headroom for scratch / regalloc
    mt = max(1, budget // max(per_mode, 1))
    if M >= 4:                                   # >= ~4 grid steps: keeps both v7x
        mt = min(mt, -(-M // 4))                 # TensorCores busy + pipelined DMA
    elif M >= 2:
        mt = min(mt, -(-M // 2))
    return int(max(1, min(mt, M)))


def _stacked_mode_matmul(xs, ws, *, mode_tile=None):
    """xs: (M, Bp, Kp) bf16, ws: (M, Kp, Np) bf16 -> (M, Bp, Np) float32."""
    M, b_pad, k_pad = xs.shape
    n_pad = ws.shape[-1]
    vmem_limit = _default_vmem_limit_bytes()
    mt = mode_tile or _choose_mode_tile(M, b_pad, k_pad, n_pad, vmem_limit)

    # Pad the mode axis so every grid step sees a full block (no edge masking).
    m_pad = _round_up(M, mt)
    if m_pad != M:
        xs = jnp.pad(xs, ((0, m_pad - M), (0, 0), (0, 0)))
        ws = jnp.pad(ws, ((0, m_pad - M), (0, 0), (0, 0)))

    grid = (m_pad // mt,)
    flops = 2 * m_pad * b_pad * k_pad * n_pad
    bytes_accessed = 2 * (xs.size + ws.size) + 4 * m_pad * b_pad * n_pad

    out = pl.pallas_call(
        _spectral_matmul_kernel,
        out_shape=jax.ShapeDtypeStruct((m_pad, b_pad, n_pad), jnp.float32),
        grid=grid,
        in_specs=[
            pl.BlockSpec((mt, b_pad, k_pad), lambda i: (i, 0, 0)),
            pl.BlockSpec((mt, k_pad, n_pad), lambda i: (i, 0, 0)),
        ],
        out_specs=pl.BlockSpec((mt, b_pad, n_pad), lambda i: (i, 0, 0)),
        compiler_params=pltpu.CompilerParams(
            dimension_semantics=("parallel",),
            vmem_limit_bytes=vmem_limit,
        ),
        cost_estimate=pl.CostEstimate(flops=flops, transcendentals=0,
                                      bytes_accessed=bytes_accessed),
    )(xs, ws)
    return out[:M]


# ------------------------------- forward -----------------------------------

def pack_spectral_weights(w1r, w1i, w2r, w2i, k_pad=None, n_pad=None):
    """Pack cfloat weights into the real-block (M, 2Ci_p, 2Co_p) bf16 layout."""
    ci, co, m1, m2 = w1r.shape
    M = 2 * m1 * m2
    wr = jnp.concatenate([w1r, w2r], axis=2)           # (Ci, Co, 2m1, m2)
    wi = jnp.concatenate([w1i, w2i], axis=2)
    top = jnp.concatenate([wr, wi], axis=1)            # rows multiplied by Re(x)
    bot = jnp.concatenate([-wi, wr], axis=1)           # rows multiplied by Im(x)
    wfull = jnp.concatenate([top, bot], axis=0)        # (2Ci, 2Co, 2m1, m2)
    ws = wfull.transpose(2, 3, 0, 1).reshape(M, 2 * ci, 2 * co)
    k_pad = k_pad or _round_up(2 * ci, 128)
    n_pad = n_pad or _round_up(2 * co, 128)
    ws = jnp.pad(ws, ((0, 0), (0, k_pad - 2 * ci), (0, n_pad - 2 * co)))
    return ws.astype(jnp.bfloat16)


def spectral_conv2d_pro(x, w1r, w1i, w2r, w2i, modes1, modes2):
    """SpectralConv2dPro.forward.

    x : (B, Cin, H, W) float32
    w{1,2}{r,i} : (Cin, Cout, modes1, modes2) float32 (real/imag of cfloat weights)
    returns (B, Cout, H, W) float32
    """
    B, Ci, H, W = x.shape
    Co = w1r.shape[1]
    Wf = W // 2 + 1
    assert 2 * modes1 <= H and modes2 <= Wf
    M = 2 * modes1 * modes2

    # TODO(synk): rfft2 / irfft2 have no Pallas primitive; they run through XLA.
    x_ft = jnp.fft.rfft2(x, axes=(-2, -1))             # (B, Ci, H, Wf) complex64

    # Gather both mode corners and put the modes on the leading axis.
    corner = jnp.concatenate(
        [x_ft[:, :, :modes1, :modes2], x_ft[:, :, H - modes1:, :modes2]],
        axis=2)                                        # (B, Ci, 2m1, m2)
    corner = corner.transpose(2, 3, 0, 1).reshape(M, B, Ci)   # (M, B, Ci) complex
    # complex-as-real contraction: xs last dim = [Re | Im] over input channels.
    # TODO(synk): a complex64->f32 bitcast would save one HBM pass here, but
    # XLA bitcast-convert does not take complex operands, so use real/imag.
    xs = jnp.concatenate(
        [jnp.real(corner), jnp.imag(corner)], axis=-1).astype(jnp.float32)

    b_pad = _round_up(B, 16)          # sublane-friendly (bf16 packs 16 rows/vreg)
    k_pad = _round_up(2 * Ci, 128)    # contraction dim -> lane multiple
    n_pad = _round_up(2 * Co, 128)    # output lane dim -> unmasked vst
    xs = jnp.pad(xs, ((0, 0), (0, b_pad - B), (0, k_pad - 2 * Ci)))
    xs = xs.astype(jnp.bfloat16)

    # TODO(synk): if the weights are static across calls, hoist
    # pack_spectral_weights out of the jitted forward and pass ws directly.
    ws = pack_spectral_weights(w1r, w1i, w2r, w2i, k_pad=k_pad, n_pad=n_pad)

    out = _stacked_mode_matmul(xs, ws)                 # (M, b_pad, n_pad) f32
    out = out[:, :B, :]
    out_c = jax.lax.complex(out[:, :, :Co], out[:, :, Co:2 * Co])    # (M, B, Co)
    out_c = out_c.reshape(2 * modes1, modes2, B, Co).transpose(2, 3, 0, 1)

    # (B, Co, 2m1, m2): rebuild out_ft with concat + pad (no scatters).
    out_top = out_c[:, :, :modes1, :]
    out_bot = out_c[:, :, modes1:, :]
    mid = jnp.zeros((B, Co, H - 2 * modes1, modes2), dtype=jnp.complex64)
    rows = jnp.concatenate([out_top, mid, out_bot], axis=2)          # (B,Co,H,m2)
    out_ft = jnp.pad(rows, ((0, 0), (0, 0), (0, 0), (0, Wf - modes2)))
    return jnp.fft.irfft2(out_ft, s=(H, W), axes=(-2, -1)).astype(jnp.float32)


# ------------------------------ reference -----------------------------------

def spectral_conv2d_pro_ref(x, w1r, w1i, w2r, w2i, modes1, modes2):
    """Pure-JAX mirror of the PyTorch reference (for correctness checking)."""
    B, Ci, H, W = x.shape
    Co = w1r.shape[1]
    w1 = jax.lax.complex(w1r, w1i)
    w2 = jax.lax.complex(w2r, w2i)
    x_ft = jnp.fft.rfft2(x, axes=(-2, -1))
    out_ft = jnp.zeros((B, Co, H, W // 2 + 1), dtype=jnp.complex64)
    out_ft = out_ft.at[:, :, :modes1, :modes2].set(
        jnp.einsum('bixy,ioxy->boxy', x_ft[:, :, :modes1, :modes2], w1))
    out_ft = out_ft.at[:, :, -modes1:, :modes2].set(
        jnp.einsum('bixy,ioxy->boxy', x_ft[:, :, -modes1:, :modes2], w2))
    return jnp.fft.irfft2(out_ft, s=(H, W), axes=(-2, -1))


# ---------------------------- parameter init --------------------------------

def init_params(key, in_channels, out_channels, modes1, modes2):
    # Matches the module: scale = sqrt(2/(in+out)); torch.rand on cfloat draws
    # real and imag independently uniform in [0, 1).
    scale = math.sqrt(2.0 / (in_channels + out_channels))
    k1r, k1i, k2r, k2i = jax.random.split(key, 4)
    shape = (in_channels, out_channels, modes1, modes2)

    def u(k):
        return scale * jax.random.uniform(k, shape, dtype=jnp.float32)

    return {'w1r': u(k1r), 'w1i': u(k1i), 'w2r': u(k2r), 'w2i': u(k2i)}


if __name__ == "__main__":
    key = jax.random.PRNGKey(0)
    kx, kp = jax.random.split(key)

    B, Cin, Cout, S = 2, 8, 8, 16
    modes1, modes2 = 4, 4

    x = jax.random.normal(kx, (B, Cin, S, S), dtype=jnp.float32)
    p = init_params(kp, Cin, Cout, modes1, modes2)

    fwd = jax.jit(partial(spectral_conv2d_pro, modes1=modes1, modes2=modes2))
    out = fwd(x, p['w1r'], p['w1i'], p['w2r'], p['w2i'])
    jax.block_until_ready(out)

    ref = spectral_conv2d_pro_ref(x, p['w1r'], p['w1i'], p['w2r'], p['w2i'],
                                  modes1, modes2)
    err = float(jnp.max(jnp.abs(out - ref)))
    denom = float(jnp.max(jnp.abs(ref))) + 1e-6

    assert out.shape == (B, Cout, S, S), out.shape
    assert out.dtype == jnp.float32
    assert err <= 2e-2 * denom, (err, denom)
    print("KERNEL_OK")
</pallas_src>

<mosaic_0001>
module attributes {stable_mosaic.version = 11 : i64} {
  func.func @_spectral_matmul_kernel(%arg0: i32, %arg1: memref<8x16x128xbf16, #tpu.memory_space<vmem>>, %arg2: memref<8x128x128xbf16, #tpu.memory_space<vmem>>, %arg3: memref<8x16x128xf32, #tpu.memory_space<vmem>>) attributes {dimension_semantics = [#tpu.dimension_semantics<parallel>], iteration_bounds = array<i64: 4>, scalar_prefetch = 0 : i64, scratch_operands = 0 : i64, tpu.core_type = #tpu.core_type<tc>, window_params = [{transform_indices = @transform_0, window_bounds = array<i64: 8, 16, 128>}, {transform_indices = @transform_1, window_bounds = array<i64: 8, 128, 128>}, {transform_indices = @transform_2, window_bounds = array<i64: 8, 16, 128>}]} {
    %c0 = arith.constant 0 : index
    %c0_0 = arith.constant 0 : index
    %c0_1 = arith.constant 0 : index
    %0 = vector.load %arg1[%c0, %c0_0, %c0_1] : memref<8x16x128xbf16, #tpu.memory_space<vmem>>, vector<8x16x128xbf16>
    %c0_2 = arith.constant 0 : index
    %c0_3 = arith.constant 0 : index
    %c0_4 = arith.constant 0 : index
    %1 = vector.load %arg2[%c0_2, %c0_3, %c0_4] : memref<8x128x128xbf16, #tpu.memory_space<vmem>>, vector<8x128x128xbf16>
    "tpu.trace_start"() <{level = 10 : i32, message = "mbk,mkn->mbn"}> : () -> ()
    %cst = arith.constant dense<0.000000e+00> : vector<8x16x128xf32>
    %2 = tpu.matmul %0, %1, %cst {dimension_numbers = #tpu.dot_dimension_numbers<[2], [1], [1], [2], [0, 0, 0, 1, 1, 2], [0], [0]>} : vector<8x16x128xbf16>, vector<8x128x128xbf16>, vector<8x16x128xf32> -> vector<8x16x128xf32>
    "tpu.trace_stop"() : () -> ()
    %c0_5 = arith.constant 0 : index
    %c0_6 = arith.constant 0 : index
    %c0_7 = arith.constant 0 : index
    %3 = vector.load %arg3[%c0_5, %c0_6, %c0_7] : memref<8x16x128xf32, #tpu.memory_space<vmem>>, vector<8x16x128xf32>
    tpu.vector_store %arg3[%c0_5, %c0_6, %c0_7], %2 {strides = array<i32>} : memref<8x16x128xf32, #tpu.memory_space<vmem>>, vector<8x16x128xf32>,
    return
  }
  func.func @transform_0(%arg0: i32) -> (i32, i32, i32) {
    %c0_i32 = arith.constant 0 : i32
    %c0_i32_0 = arith.constant 0 : i32
    %c0_i32_1 = arith.constant 0 : i32
    return %arg0, %c0_i32, %c0_i32_0 : i32, i32, i32
  }
  func.func @transform_1(%arg0: i32) -> (i32, i32, i32) {
    %c0_i32 = arith.constant 0 : i32
    %c0_i32_0 = arith.constant 0 : i32
    %c0_i32_1 = arith.constant 0 : i32
    return %arg0, %c0_i32, %c0_i32_0 : i32, i32, i32
  }
  func.func @transform_2(%arg0: i32) -> (i32, i32, i32) {
    %c0_i32 = arith.constant 0 : i32
    %c0_i32_0 = arith.constant 0 : i32
    %c0_i32_1 = arith.constant 0 : i32
    return %arg0, %c0_i32, %c0_i32_0 : i32, i32, i32
  }
}

</mosaic_0001>

<bundles_post_ra>
// kernel: spectral_conv2d_pro.1
= control target key start
LH: loop header
LB: loop body
LE: loop exit
PB: predicated region body
PF: predicated region fallthrough
CT: control target
= control target key end

     0   :  { %7 = vsyncpa [#allocation3], 0  ;;  %s2247_s0 = inlined_call_operand.hbm [shape: bf16[32,16,128], index: 0, kind: input, shape index: {}]   ;;  %s2248_s1 = inlined_call_operand.hbm [shape: bf16[32,128,128], index: 1, kind: input, shape index: {}]   ;;  %s2249_s2 = inlined_call_operand.hbm [shape: f32[32,16,128], index: 2, kind: output, shape index: {}]  }
   0x1   :  { %9 = vsyncpa [#allocation3 + $0x1], 0 }
   0x2   :  { %10 = vsyncpa [#allocation6], 0 }
   0x3   :  { %12 = vsyncpa [#allocation6 + $0x1], 0 }
   0x4   :  { %13 = vsyncpa [#allocation4], 0 }
   0x5   :  { %15 = vsyncpa [#allocation4 + $0x1], 0  ;;  %s1855_s9 = smov 0   ;;  %s1857_s10 = smov 0  }
   0x6   :  { %s1859_s11 = smov 0   ;;  %s1861_s12 = smov 0  }
   0x7 LB: > { %s1876_s13 = sadd.s32 4294967295, %s1829_s12   ;;  %s1239_s14 = sadd.s32 4294967294, %s1829_s12   ;;  %s1829_s12 = sphi %s1861_s12, %s2264_s12   ;;  %s1825_s11 = sphi %s1859_s11, %s2263_s11   ;;  %s1821_s10 = sphi %s1857_s10, %s2262_s10   ;;  %s1817_s9 = sphi %s1855_s9, %s2261_s9  }
   0x8   : > { %s1880_s15 = sadd.s32 1, %s1829_s12   ;;  %s28_s16 = sadd.s32 1, %s1825_s11 }
   0x9   : > { %s25_s17 = ssub.s32 %s1829_s12, %s1880_s15  ;;  %p35_p0 = scmp.ne.s32.totalorder %s1825_s11, %s1821_s10 }
   0xa   : > { %p26_p1 = scmp.eq.s32.totalorder %s25_s17, 0  ;;  %p36_p2 = scmp.eq.s32.totalorder %s1829_s12, 0 }
   0xb   : > { %p41_p3 = scmp.ne.s32.totalorder %s1821_s10, %s1817_s9  ;;  %p42_p4 = scmp.eq.s32.totalorder %s1876_s13, 0 }
   0xc   : > { %s1892_s18 = scalar_select %p26_p1, %s1825_s11, %s28_s16  }
   0xd   : > { %p1894_p5 = por %p36_p2, %p35_p0  ;;  %p1898_p6 = por %p42_p4, %p41_p3 }
   0xe   : > { %p91_p7 = scmp.eq.s32.totalorder %s1876_s13, 3  ;;  %p97_p8 = scmp.eq.s32.totalorder %s1239_s14, 3 }
   0xf   : > { %s2253_s20 = scalar_select %p1898_p6, 1, 0 }
  0x10   : > { %p1587_p9 = scmp.lt.s32.totalorder %s1829_s12, 4  ;;  %p1904_p10 = por %p91_p7, %p35_p0 }
  0x11   : > { %p1908_p11 = por %p97_p8, %p41_p3  ;;  %s1913_s23 = sand.u32 1, %s1825_s11  }
  0x12   : > { %s2254_s21 = scalar_select %p1904_p10, 1, 0 }
  0x13   : > { %s2255_s22 = scalar_select %p1908_p11, 1, 0 }
  0x14   : > { %s1333_s24 = sshll.u32 %s1829_s12, 10  ;;  %s1242_s25 = sshll.u32 %s1913_s23, 6 }
  0x15   : > { %s1920_s28 = scalar_lea.hbm %s2247_s0, %s1333_s24  ;;  %s121_s29 = scalar_lea.vmem [#allocation2], %s1242_s25 }
  0x16   : > { %s129_s30 = sshll.u32 %s121_s29, 4  ;;  %p1924_p12 = pnand %p1587_p9, %p1894_p5  ;;  %s1928_s30 = int_to_ptr.vmem [resolvable:$true] %s129_s30 }
  0x17   : > { %s118_s4 = scalar_lea.sflag [#allocation3], %s1913_s23  ;;  %s1699_s5 = scalar_lea.hbm %s1920_s28, 1024 }
  0x18   : > { %p1700_p13 = scmp.ne.s32.totalorder %s1920_s28, %s1699_s5  ;;  %p1701_p0 = pneg %p1924_p12 }
  0x19   : > { %s1704_s8 = scalar_lea.hbm %s2247_s0, 4096  ;;  %p1705_p3 = scmp.lt.u32.totalorder %s1920_s28, %s2247_s0 }
  0x1a   : > { %p1702_p1 = pnand %p1701_p0, %p1700_p13  ;;  %p1706_p4 = scmp.lt.u32.totalorder %s1704_s8, %s1699_s5 }
  0x1b   : > { %p1708_p7 = scmp.lt.u32.totalorder %s1699_s5, %s1920_s28 }
  0x1c   : > { %p1703_p2 = pneg %p1702_p1  ;;  %p1707_p5 = por %p1706_p4, %p1705_p3 }
  0x1e   : > { %p1709_p8 = por %p1708_p7, %p1707_p5 }
  0x20   : > { %p1710_p9 = pnand %p1709_p8, %p1703_p2 }
  0x22   : > { %1713 = shalt.err (!%p1710_p9)
}
  0x23   : > { %s1714_s17 = scalar_lea.vmem %s1928_s30, 1024  ;;  %s1831_s19 = smov [#allocation2]  }
  0x24   : > { %p1715_p13 = scmp.ne.s32.totalorder %s1928_s30, %s1714_s17  ;;  %s1719_s24 = sshll.u32 %s1831_s19, 4  ;;  %s1720_s24 = int_to_ptr.vmem [resolvable:$false] %s1719_s24 }
  0x25   : > { %s1721_s25 = scalar_lea.vmem %s1720_s24, 2048  ;;  %p1722_p10 = scmp.lt.s32.totalorder %s1928_s30, %s1720_s24 }
  0x26   : > { %p1717_p1 = pnand %p1715_p13, %p1701_p0  ;;  %p1723_p3 = scmp.lt.s32.totalorder %s1721_s25, %s1714_s17 }
  0x28   : > { %p1718_p11 = pneg %p1717_p1  ;;  %p1724_p4 = por %p1723_p3, %p1722_p10 }
  0x2a   : > { %p1725_p5 = pnand %p1724_p4, %p1718_p11 }
  0x2c   : > { %1728 = shalt.err (!%p1725_p5)
}
  0x2d   : > { %s1832_s26 = smov 64   ;;  %s1833_s27 = smov 4  }
  0x2e   : > { %1579 = dma.hbm_to_vmem [thread:$0]  (!%p1924_p12), %s1920_s28, 1024, %s1928_s30, %s118_s4, %s1832_s26, %s1832_s26, %s1833_s27  }
  0x2f   : > { %p1250_p10 = scmp.ge.s32.totalorder %s1829_s12, 1  ;;  %p159_p11 = scmp.lt.s32.totalorder %s1829_s12, 5 }
  0x30   : > { %s1246_s29 = sshll.u32 %s1913_s23, 9  ;;  %s1335_s6 = sshll.u32 %s1829_s12, 13 }
  0x31   : > { %p1964_p2 = pnand %p1250_p10, %p159_p11  ;;  %s143_s7 = scalar_lea.vmem [#allocation5], %s1246_s29 }
  0x32   : > { %s151_s8 = sshll.u32 %s143_s7, 4  ;;  %s1972_s17 = scalar_lea.hbm %s2248_s1, %s1335_s6  ;;  %s1974_s8 = int_to_ptr.vmem [resolvable:$true] %s151_s8 }
  0x33   : > { %s140_s28 = scalar_lea.sflag [#allocation6], %s1913_s23  ;;  %s1729_s30 = scalar_lea.hbm %s1972_s17, 8192 }
  0x34   : > { %p1730_p7 = scmp.ne.s32.totalorder %s1972_s17, %s1729_s30  ;;  %s1734_s24 = scalar_lea.hbm %s2248_s1, 32768 }
  0x35   : > { %p1735_p13 = scmp.lt.u32.totalorder %s1972_s17, %s2248_s1  ;;  %p1736_p1 = scmp.lt.u32.totalorder %s1734_s24, %s1729_s30 }
  0x36   : > { %p1732_p8 = pnand %p1730_p7, %p1701_p0  ;;  %p1738_p4 = scmp.lt.u32.totalorder %s1729_s30, %s1972_s17 }
  0x37   : > { %p1737_p3 = por %p1736_p1, %p1735_p13 }
  0x38   : > { %p1733_p9 = pneg %p1732_p8 }
  0x39   : > { %p1739_p5 = por %p1738_p4, %p1737_p3 }
  0x3b   : > { %p1740_p10 = pnand %p1739_p5, %p1733_p9 }
  0x3d   : > { %1743 = shalt.err (!%p1740_p10)
}
  0x3e   : > { %s1744_s6 = scalar_lea.vmem %s1974_s8, 8192  ;;  %s1834_s7 = smov [#allocation5]  }
  0x3f   : > { %p1745_p11 = scmp.ne.s32.totalorder %s1974_s8, %s1744_s6  ;;  %s1749_s14 = sshll.u32 %s1834_s7, 4  ;;  %s1750_s14 = int_to_ptr.vmem [resolvable:$false] %s1749_s14 }
  0x40   : > { %s1751_s16 = scalar_lea.vmem %s1750_s14, 16384  ;;  %p1752_p6 = scmp.lt.s32.totalorder %s1974_s8, %s1750_s14 }
  0x41   : > { %p1747_p7 = pnand %p1745_p11, %p1701_p0  ;;  %p1753_p13 = scmp.lt.s32.totalorder %s1751_s16, %s1744_s6 }
  0x43   : > { %p1748_p8 = pneg %p1747_p7  ;;  %p1754_p1 = por %p1753_p13, %p1752_p6 }
  0x45   : > { %p1755_p3 = pnand %p1754_p1, %p1748_p8 }
  0x47   : > { %1758 = shalt.err (!%p1755_p3)
}
  0x48   : > { %1582 = dma.hbm_to_vmem [thread:$0]  (!%p1924_p12), %s1972_s17, 8192, %s1974_s8, %s140_s28, %s1832_s26, %s1832_s26, %s1833_s27  }
  0x49   : > { %163 = sbr.rel (%p1964_p2) target bundleno = 443 (0x1bb), region = 28  ;;  %s2008_s30 = sand.u32 (!%p1964_p2), 1, %s1821_s10  }
  0x4a   : > { %s1251_s4 = sshll.u32 (!%p1964_p2), %s2008_s30, 6  ;;  %s166_s19 = scalar_lea.sflag (!%p1964_p2), [#allocation3], %s2008_s30 }
  0x4b   : > { %s2012_s3 = scalar_lea.vmem (!%p1964_p2), [#allocation2], %s1251_s4  ;;  %p2258_p6 = scmp.ne.s32.totalorder (!%p1964_p2), %s2253_s20, 0 }
  0x50   : > { %1804 = dma.done.wait (%p2258_p6), %s166_s19, 1024  }
  0x51   : > { %1806 = vsyncadd (%p2258_p6), %s166_s19, 4294966272  ;;  %s1252_s23 = sshll.u32 %s2008_s30, 9  ;;  %s175_s26 = scalar_lea.sflag [#allocation6], %s2008_s30 }
  0x52   : > { %s2020_s27 = scalar_lea.vmem [#allocation5], %s1252_s23 }
  0x53   : > { %1808 = dma.done.wait (%p2258_p6), %s175_s26, 8192  }
  0x54   : > { %1810 = vsyncadd (%p2258_p6), %s175_s26, 4294959104  ;;  %v1835_v0 = vmov 0.0   ;;  %vm1836_vm0 = vmmov 0   ;;  %v1627_v1 = vld [vmem:[%s2020_s27] sm:$0xff]   ;;  %v1629_v3 = vld [vmem:[%s2020_s27 + $0x8] sm:$0xff]   ;;  %s1253_s20 = sshll.u32 %s2008_s30, 7 }
  0x55   : > { %1410 = vmatprep.subr.bf16.mxu0 %v1835_v0  ;;  %1430 = vmatprep.subr.bf16.mxu1 %v1835_v0  ;;  %v1628_v2 = vld [vmem:[%s2020_s27 + $0x40] sm:$0xff]   ;;  %v1630_v4 = vld [vmem:[%s2020_s27 + $0x48] sm:$0xff]   ;;  %v1631_v5 = vld [vmem:[%s2020_s27 + $0x10] sm:$0xff]   ;;  %s2179_s5 = scalar_lea.vmem [#allocation7], %s1253_s20  ;;  %s1337_s8 = sshll.u32 %s1876_s13, 11 }
  0x56   : > { %1426 = vmatprep.mubr.msk.bf16.mxu0 %vm1836_vm0, %v1835_v0  ;;  %1446 = vmatprep.mubr.msk.bf16.mxu1 %vm1836_vm0, %v1835_v0  ;;  %v1632_v6 = vld [vmem:[%s2020_s27 + $0x50] sm:$0xff]   ;;  %v1633_v7 = vld [vmem:[%s2020_s27 + $0x18] sm:$0xff]   ;;  %v1635_v9 = vld [vmem:[%s2020_s27 + $0x20] sm:$0xff]   ;;  %s1143_s17 = sshll.u32 %s2179_s5, 4  ;;  %s2199_s25 = scalar_lea.hbm %s2249_s2, %s1337_s8  ;;  %s2201_s17 = int_to_ptr.vmem [resolvable:$true] %s1143_s17 }
  0x57   : > { %1411 = vmatpush3.bf16.msra.mxu0 %v1627_v1  ;;  %1431 = vmatpush3.bf16.msra.mxu1 %v1628_v2  ;;  %v1634_v8 = vld [vmem:[%s2020_s27 + $0x58] sm:$0xff]   ;;  %v1636_v10 = vld [vmem:[%s2020_s27 + $0x60] sm:$0xff]   ;;  %v1637_v11 = vld [vmem:[%s2020_s27 + $0x28] sm:$0xff]   ;;  %s1129_s13 = scalar_lea.sflag [#allocation4], %s2008_s30  ;;  %s1759_s29 = scalar_lea.vmem %s2201_s17, 2048 }
  0x58   : > { %1412 = vmatprep.subr.bf16.mxu0 %v1835_v0  ;;  %1432 = vmatprep.subr.bf16.mxu1 %v1835_v0  ;;  %v1638_v12 = vld [vmem:[%s2020_s27 + $0x68] sm:$0xff]   ;;  %v1639_v13 = vld [vmem:[%s2020_s27 + $0x30] sm:$0xff]   ;;  %v1641_v15 = vld [vmem:[%s2020_s27 + $0x38] sm:$0xff]   ;;  %p1760_p12 = scmp.ne.s32.totalorder %s2201_s17, %s1759_s29  ;;  %p2259_p0 = scmp.ne.s32.totalorder %s2254_s21, 0 }
  0x59   : > { %v1640_v14 = vld [vmem:[%s2020_s27 + $0x70] sm:$0xff]   ;;  %v1642_v16 = vld [vmem:[%s2020_s27 + $0x78] sm:$0xff]   ;;  %v1643_v17 = vld [vmem:[%s2012_s3] sm:$0xff]   ;;  %s1837_s6 = smov [#allocation7]  }
  0x5a   : > { %v1644_v18 = vld [vmem:[%s2012_s3 + $0x8] sm:$0xff]   ;;  %v1645_v19 = vld [vmem:[%s2020_s27 + $0x80] sm:$0xff]   ;;  %v1649_v23 = vld [vmem:[%s2020_s27 + $0x90] sm:$0xff]   ;;  %p1761_p2 = pnand %p1760_p12, %p2259_p0  ;;  %s1763_s7 = sshll.u32 %s1837_s6, 4  ;;  %s1764_s7 = int_to_ptr.vmem [resolvable:$false] %s1763_s7 }
  0x5b   : > { %1413 = vmatpush3.bf16.msra.mxu0 %v1629_v3  ;;  %1433 = vmatpush3.bf16.msra.mxu1 %v1630_v4  ;;  %v1646_v20 = vld [vmem:[%s2020_s27 + $0xc0] sm:$0xff]   ;;  %v1647_v21 = vld [vmem:[%s2020_s27 + $0x88] sm:$0xff]   ;;  %v1650_v24 = vld [vmem:[%s2020_s27 + $0xd0] sm:$0xff]   ;;  %s1765_s14 = scalar_lea.vmem %s1764_s7, 4096  ;;  %p1766_p4 = scmp.lt.s32.totalorder %s2201_s17, %s1764_s7 }
  0x5c   : > { %1414 = vmatprep.subr.bf16.mxu0 %v1835_v0  ;;  %1434 = vmatprep.subr.bf16.mxu1 %v1835_v0  ;;  %v1648_v22 = vld [vmem:[%s2020_s27 + $0xc8] sm:$0xff]   ;;  %v1651_v25 = vld [vmem:[%s2020_s27 + $0x98] sm:$0xff]   ;;  %v1653_v27 = vld [vmem:[%s2020_s27 + $0xa0] sm:$0xff]   ;;  %p1762_p9 = pneg %p1761_p2  ;;  %p1767_p5 = scmp.lt.s32.totalorder %s1765_s14, %s1759_s29 }
  0x5d   : > { %v1652_v26 = vld [vmem:[%s2020_s27 + $0xd8] sm:$0xff]   ;;  %v1654_v28 = vld [vmem:[%s2020_s27 + $0xe0] sm:$0xff]   ;;  %v1655_v29 = vld [vmem:[%s2020_s27 + $0xa8] sm:$0xff]  }
  0x5e   : > { %v1656_v30 = vld [vmem:[%s2020_s27 + $0xe8] sm:$0xff]   ;;  %v1657_v31 = vld [vmem:[%s2020_s27 + $0xb0] sm:$0xff]   ;;  %v1659_v33 = vld [vmem:[%s2020_s27 + $0xb8] sm:$0xff]   ;;  %p1768_p10 = por %p1767_p5, %p1766_p4 }
  0x5f   : > { %1415 = vmatpush3.bf16.msra.mxu0 %v1631_v5  ;;  %1435 = vmatpush3.bf16.msra.mxu1 %v1632_v6  ;;  %v1658_v32 = vld [vmem:[%s2020_s27 + $0xf0] sm:$0xff]   ;;  %v1660_v34 = vld [vmem:[%s2020_s27 + $0xf8] sm:$0xff]   ;;  %v1663_v37 = vld [vmem:[%s2020_s27 + $0x100] sm:$0xff]  }
  0x60   : > { %1416 = vmatprep.subr.bf16.mxu0 %v1835_v0  ;;  %1436 = vmatprep.subr.bf16.mxu1 %v1835_v0  ;;  %v1661_v35 = vld [vmem:[%s2012_s3 + $0x10] sm:$0xff]   ;;  %v1662_v36 = vld [vmem:[%s2012_s3 + $0x18] sm:$0xff]   ;;  %v1664_v38 = vld [vmem:[%s2020_s27 + $0x140] sm:$0xff]   ;;  %p1769_p11 = pnand %p1768_p10, %p1762_p9 }
  0x61   : > { %v1665_v39 = vld [vmem:[%s2020_s27 + $0x108] sm:$0xff]   ;;  %v1667_v41 = vld [vmem:[%s2020_s27 + $0x110] sm:$0xff]   ;;  %v1669_v43 = vld [vmem:[%s2020_s27 + $0x118] sm:$0xff]  }
  0x62   : > { %v1666_v40 = vld [vmem:[%s2020_s27 + $0x148] sm:$0xff]   ;;  %v1668_v42 = vld [vmem:[%s2020_s27 + $0x150] sm:$0xff]   ;;  %v1670_v44 = vld [vmem:[%s2020_s27 + $0x158] sm:$0xff]  }
  0x63   : > { %1417 = vmatpush3.bf16.msra.mxu0 %v1633_v7  ;;  %1437 = vmatpush3.bf16.msra.mxu1 %v1634_v8  ;;  %v1671_v45 = vld [vmem:[%s2020_s27 + $0x120] sm:$0xff]   ;;  %v1673_v47 = vld [vmem:[%s2020_s27 + $0x128] sm:$0xff]   ;;  %v1675_v49 = vld [vmem:[%s2020_s27 + $0x130] sm:$0xff]  }
  0x64   : > { %1418 = vmatprep.subr.bf16.mxu0 %v1835_v0  ;;  %1438 = vmatprep.subr.bf16.mxu1 %v1835_v0  ;;  %v1672_v46 = vld [vmem:[%s2020_s27 + $0x160] sm:$0xff]   ;;  %v1674_v48 = vld [vmem:[%s2020_s27 + $0x168] sm:$0xff]   ;;  %v1676_v50 = vld [vmem:[%s2020_s27 + $0x170] sm:$0xff]  }
  0x65   : > { %v1677_v51 = vld [vmem:[%s2020_s27 + $0x138] sm:$0xff]   ;;  %v1679_v53 = vld [vmem:[%s2012_s3 + $0x20] sm:$0xff]   ;;  %v1680_v54 = vld [vmem:[%s2012_s3 + $0x28] sm:$0xff]  }
  0x66   : > { %v1678_v52 = vld [vmem:[%s2020_s27 + $0x178] sm:$0xff]   ;;  %v1681_v55 = vld [vmem:[%s2020_s27 + $0x180] sm:$0xff]   ;;  %v1683_v57 = vld [vmem:[%s2020_s27 + $0x188] sm:$0xff]  }
  0x67   : > { %1419 = vmatpush3.bf16.msra.mxu0 %v1635_v9  ;;  %1439 = vmatpush3.bf16.msra.mxu1 %v1636_v10  ;;  %v1682_v56 = vld [vmem:[%s2020_s27 + $0x1c0] sm:$0xff]   ;;  %v1684_v58 = vld [vmem:[%s2020_s27 + $0x1c8] sm:$0xff]   ;;  %v1685_v59 = vld [vmem:[%s2020_s27 + $0x190] sm:$0xff]  }
  0x68   : > { %1420 = vmatprep.subr.bf16.mxu0 %v1835_v0  ;;  %1440 = vmatprep.subr.bf16.mxu1 %v1835_v0  ;;  %v1686_v60 = vld [vmem:[%s2020_s27 + $0x1d0] sm:$0xff]   ;;  %v1687_v61 = vld [vmem:[%s2020_s27 + $0x198] sm:$0xff]   ;;  %v1689_v63 = vld [vmem:[%s2020_s27 + $0x1a0] sm:$0xff]  }
  0x69   : > { %v1688_v62 = vld [vmem:[%s2020_s27 + $0x1d8] sm:$0xff]   ;;  %v1690_v1 = vld [vmem:[%s2020_s27 + $0x1e0] sm:$0xff]   ;;  %v1691_v2 = vld [vmem:[%s2020_s27 + $0x1a8] sm:$0xff]  }
  0x6a   : > { %v1692_v3 = vld [vmem:[%s2020_s27 + $0x1e8] sm:$0xff]   ;;  %v1693_v4 = vld [vmem:[%s2020_s27 + $0x1b0] sm:$0xff]   ;;  %v1695_v6 = vld [vmem:[%s2020_s27 + $0x1b8] sm:$0xff]  }
  0x6b   : > { %1421 = vmatpush3.bf16.msra.mxu0 %v1637_v11  ;;  %1441 = vmatpush3.bf16.msra.mxu1 %v1638_v12  ;;  %v1694_v5 = vld [vmem:[%s2020_s27 + $0x1f0] sm:$0xff]   ;;  %v1696_v7 = vld [vmem:[%s2020_s27 + $0x1f8] sm:$0xff]  }
  0x6c   : > { %1422 = vmatprep.subr.bf16.mxu0 %v1835_v0  ;;  %1442 = vmatprep.subr.bf16.mxu1 %v1835_v0  ;;  %v1697_v8 = vld [vmem:[%s2012_s3 + $0x30] sm:$0xff]   ;;  %v1698_v9 = vld [vmem:[%s2012_s3 + $0x38] sm:$0xff]  }
  0x6f   : > { %1423 = vmatpush3.bf16.msra.mxu0 %v1639_v13  ;;  %1443 = vmatpush3.bf16.msra.mxu1 %v1640_v14 }
  0x70   : > { %1424 = vmatprep.subr.bf16.mxu0 %v1835_v0  ;;  %1444 = vmatprep.subr.bf16.mxu1 %v1835_v0 }
  0x73   : > { %1425 = vmatpush3.bf16.msra.mxu0 %v1641_v15  ;;  %1445 = vmatpush3.bf16.msra.mxu1 %v1642_v16 }
  0x74   : > { %1450 = vmatprep.subr.bf16.mxu0 %v1835_v0  ;;  %1470 = vmatprep.subr.bf16.mxu1 %v1835_v0 }
  0x76   : > { %1427 = vmatmul.mubr.bf16.vlgmr.msra.gmra.mrb[0].mxu0 %v1643_v17  ;;  %1447 = vmatmul.mubr.bf16.vlgmr.msra.gmra.mrb[0].mxu1 %v1644_v18 }
  0x77   : > { %1451 = vmatpush3.bf16.msra.mxu0 %v1645_v19  ;;  %1471 = vmatpush3.bf16.msra.mxu1 %v1646_v20 }
  0x78   : > { %1452 = vmatprep.subr.bf16.mxu0 %v1835_v0  ;;  %1472 = vmatprep.subr.bf16.mxu1 %v1835_v0 }
  0x79   : > { %1466 = vmatprep.mubr.msk.bf16.mxu0 %vm1836_vm0, %v1835_v0  ;;  %1486 = vmatprep.mubr.msk.bf16.mxu1 %vm1836_vm0, %v1835_v0 }
  0x7b   : > { %1453 = vmatpush3.bf16.msra.mxu0 %v1647_v21  ;;  %1473 = vmatpush3.bf16.msra.mxu1 %v1648_v22 }
  0x7c   : > { %1454 = vmatprep.subr.bf16.mxu0 %v1835_v0  ;;  %1474 = vmatprep.subr.bf16.mxu1 %v1835_v0 }
  0x7f   : > { %1455 = vmatpush3.bf16.msra.mxu0 %v1649_v23  ;;  %1475 = vmatpush3.bf16.msra.mxu1 %v1650_v24 }
  0x80   : > { %1456 = vmatprep.subr.bf16.mxu0 %v1835_v0  ;;  %1476 = vmatprep.subr.bf16.mxu1 %v1835_v0 }
  0x83   : > { %1457 = vmatpush3.bf16.msra.mxu0 %v1651_v25  ;;  %1477 = vmatpush3.bf16.msra.mxu1 %v1652_v26 }
  0x84   : > { %1458 = vmatprep.subr.bf16.mxu0 %v1835_v0  ;;  %1478 = vmatprep.subr.bf16.mxu1 %v1835_v0 }
  0x87   : > { %1459 = vmatpush3.bf16.msra.mxu0 %v1653_v27  ;;  %1479 = vmatpush3.bf16.msra.mxu1 %v1654_v28 }
  0x88   : > { %1460 = vmatprep.subr.bf16.mxu0 %v1835_v0  ;;  %1480 = vmatprep.subr.bf16.mxu1 %v1835_v0 }
  0x8b   : > { %1461 = vmatpush3.bf16.msra.mxu0 %v1655_v29  ;;  %1481 = vmatpush3.bf16.msra.mxu1 %v1656_v30 }
  0x8c   : > { %1462 = vmatprep.subr.bf16.mxu0 %v1835_v0  ;;  %1482 = vmatprep.subr.bf16.mxu1 %v1835_v0 }
  0x8f   : > { %1463 = vmatpush3.bf16.msra.mxu0 %v1657_v31  ;;  %1483 = vmatpush3.bf16.msra.mxu1 %v1658_v32 }
  0x90   : > { %1464 = vmatprep.subr.bf16.mxu0 %v1835_v0  ;;  %1484 = vmatprep.subr.bf16.mxu1 %v1835_v0 }
  0x93   : > { %1465 = vmatpush3.bf16.msra.mxu0 %v1659_v33  ;;  %1485 = vmatpush3.bf16.msra.mxu1 %v1660_v34 }
  0x94   : > { %1490 = vmatprep.subr.bf16.mxu0 %v1835_v0  ;;  %1510 = vmatprep.subr.bf16.mxu1 %v1835_v0 }
  0x96   : > { %1467 = vmatmul.mubr.bf16.vlgmr.msra.gmra.mrb[4].mxu0 %v1661_v35  ;;  %1487 = vmatmul.mubr.bf16.vlgmr.msra.gmra.mrb[4].mxu1 %v1662_v36 }
  0x97   : > { %1491 = vmatpush3.bf16.msra.mxu0 %v1663_v37  ;;  %1511 = vmatpush3.bf16.msra.mxu1 %v1664_v38 }
  0x98   : > { %1492 = vmatprep.subr.bf16.mxu0 %v1835_v0  ;;  %1512 = vmatprep.subr.bf16.mxu1 %v1835_v0 }
  0x99   : > { %1506 = vmatprep.mubr.msk.bf16.mxu0 %vm1836_vm0, %v1835_v0  ;;  %1526 = vmatprep.mubr.msk.bf16.mxu1 %vm1836_vm0, %v1835_v0 }
  0x9b   : > { %1493 = vmatpush3.bf16.msra.mxu0 %v1665_v39  ;;  %1513 = vmatpush3.bf16.msra.mxu1 %v1666_v40 }
  0x9c   : > { %1494 = vmatprep.subr.bf16.mxu0 %v1835_v0  ;;  %1514 = vmatprep.subr.bf16.mxu1 %v1835_v0 }
  0x9f   : > { %1495 = vmatpush3.bf16.msra.mxu0 %v1667_v41  ;;  %1515 = vmatpush3.bf16.msra.mxu1 %v1668_v42 }
  0xa0   : > { %1496 = vmatprep.subr.bf16.mxu0 %v1835_v0  ;;  %1516 = vmatprep.subr.bf16.mxu1 %v1835_v0 }
  0xa3   : > { %1497 = vmatpush3.bf16.msra.mxu0 %v1669_v43  ;;  %1517 = vmatpush3.bf16.msra.mxu1 %v1670_v44 }
  0xa4   : > { %1498 = vmatprep.subr.bf16.mxu0 %v1835_v0  ;;  %1518 = vmatprep.subr.bf16.mxu1 %v1835_v0 }
  0xa7   : > { %1499 = vmatpush3.bf16.msra.mxu0 %v1671_v45  ;;  %1519 = vmatpush3.bf16.msra.mxu1 %v1672_v46 }
  0xa8   : > { %1500 = vmatprep.subr.bf16.mxu0 %v1835_v0  ;;  %1520 = vmatprep.subr.bf16.mxu1 %v1835_v0 }
  0xab   : > { %1501 = vmatpush3.bf16.msra.mxu0 %v1673_v47  ;;  %1521 = vmatpush3.bf16.msra.mxu1 %v1674_v48 }
  0xac   : > { %1502 = vmatprep.subr.bf16.mxu0 %v1835_v0  ;;  %1522 = vmatprep.subr.bf16.mxu1 %v1835_v0 }
  0xaf   : > { %1503 = vmatpush3.bf16.msra.mxu0 %v1675_v49  ;;  %1523 = vmatpush3.bf16.msra.mxu1 %v1676_v50 }
  0xb0   : > { %1504 = vmatprep.subr.bf16.mxu0 %v1835_v0  ;;  %1524 = vmatprep.subr.bf16.mxu1 %v1835_v0 }
  0xb3   : > { %1505 = vmatpush3.bf16.msra.mxu0 %v1677_v51  ;;  %1525 = vmatpush3.bf16.msra.mxu1 %v1678_v52 }
  0xb4   : > { %1530 = vmatprep.subr.bf16.mxu0 %v1835_v0  ;;  %1550 = vmatprep.subr.bf16.mxu1 %v1835_v0 }
  0xb6   : > { %1507 = vmatmul.mubr.bf16.vlgmr.msra.gmra.mrb[8].mxu0 %v1679_v53  ;;  %1527 = vmatmul.mubr.bf16.vlgmr.msra.gmra.mrb[8].mxu1 %v1680_v54 }
  0xb7   : > { %1531 = vmatpush3.bf16.msra.mxu0 %v1681_v55  ;;  %1551 = vmatpush3.bf16.msra.mxu1 %v1682_v56 }
  0xb8   : > { %1532 = vmatprep.subr.bf16.mxu0 %v1835_v0  ;;  %1552 = vmatprep.subr.bf16.mxu1 %v1835_v0 }
  0xb9   : > { %1546 = vmatprep.mubr.msk.bf16.mxu0 %vm1836_vm0, %v1835_v0  ;;  %1566 = vmatprep.mubr.msk.bf16.mxu1 %vm1836_vm0, %v1835_v0 }
  0xbb   : > { %1533 = vmatpush3.bf16.msra.mxu0 %v1683_v57  ;;  %1553 = vmatpush3.bf16.msra.mxu1 %v1684_v58 }
  0xbc   : > { %1534 = vmatprep.subr.bf16.mxu0 %v1835_v0  ;;  %1554 = vmatprep.subr.bf16.mxu1 %v1835_v0 }
  0xbf   : > { %1535 = vmatpush3.bf16.msra.mxu0 %v1685_v59  ;;  %1555 = vmatpush3.bf16.msra.mxu1 %v1686_v60 }
  0xc0   : > { %1536 = vmatprep.subr.bf16.mxu0 %v1835_v0  ;;  %1556 = vmatprep.subr.bf16.mxu1 %v1835_v0 }
  0xc3   : > { %1537 = vmatpush3.bf16.msra.mxu0 %v1687_v61  ;;  %1557 = vmatpush3.bf16.msra.mxu1 %v1688_v62 }
  0xc4   : > { %1538 = vmatprep.subr.bf16.mxu0 %v1835_v0  ;;  %1558 = vmatprep.subr.bf16.mxu1 %v1835_v0 }
  0xc7   : > { %1539 = vmatpush3.bf16.msra.mxu0 %v1689_v63  ;;  %1559 = vmatpush3.bf16.msra.mxu1 %v1690_v1 }
  0xc8   : > { %1540 = vmatprep.subr.bf16.mxu0 %v1835_v0  ;;  %1560 = vmatprep.subr.bf16.mxu1 %v1835_v0 }
  0xcb   : > { %1541 = vmatpush3.bf16.msra.mxu0 %v1691_v2  ;;  %1561 = vmatpush3.bf16.msra.mxu1 %v1692_v3 }
  0xcc   : > { %1542 = vmatprep.subr.bf16.mxu0 %v1835_v0  ;;  %1562 = vmatprep.subr.bf16.mxu1 %v1835_v0 }
  0xcf   : > { %1543 = vmatpush3.bf16.msra.mxu0 %v1693_v4  ;;  %1563 = vmatpush3.bf16.msra.mxu1 %v1694_v5 }
  0xd0   : > { %1544 = vmatprep.subr.bf16.mxu0 %v1835_v0  ;;  %1564 = vmatprep.subr.bf16.mxu1 %v1835_v0 }
  0xd3   : > { %1545 = vmatpush3.bf16.msra.mxu0 %v1695_v6  ;;  %1565 = vmatpush3.bf16.msra.mxu1 %v1696_v7 }
  0xd6   : > { %1547 = vmatmul.mubr.bf16.vlgmr.msra.gmra.mrb[12].mxu0 %v1697_v8  ;;  %1567 = vmatmul.mubr.bf16.vlgmr.msra.gmra.mrb[12].mxu1 %v1698_v9 }
 0x149   : > { %v440_v10 = vpop.f32.mrb[0].mxu0  ;;  %v535_v11 = vpop.f32.mrb[0].mxu1 }
 0x14a   : > { %1112 = vst [vmem:[%s2179_s5] sm:$0xff] %v440_v10  ;;  %v1428_v12 = vpop.f32.mrb[1].mxu0  ;;  %1114 = vst [vmem:[%s2179_s5 + $0x10] sm:$0xff] %v535_v11  ;;  %v1448_v0 = vpop.f32.mrb[1].mxu1 }
 0x14b   : > { %v443_v13 = vpop.f32.mrb[2].mxu0  ;;  %v538_v14 = vpop.f32.mrb[2].mxu1 }
 0x14c   : > { %1113 = vst [vmem:[%s2179_s5 + $0x8] sm:$0xff] %v443_v13  ;;  %v1429_v15 = vpop.f32.mrb[3].mxu0  ;;  %1115 = vst [vmem:[%s2179_s5 + $0x18] sm:$0xff] %v538_v14  ;;  %v1449_v16 = vpop.f32.mrb[3].mxu1 }
 0x169   : > { %v630_v17 = vpop.f32.mrb[4].mxu0  ;;  %v725_v18 = vpop.f32.mrb[4].mxu1 }
 0x16a   : > { %1116 = vst [vmem:[%s2179_s5 + $0x20] sm:$0xff] %v630_v17  ;;  %v1468_v19 = vpop.f32.mrb[5].mxu0  ;;  %1118 = vst [vmem:[%s2179_s5 + $0x30] sm:$0xff] %v725_v18  ;;  %v1488_v20 = vpop.f32.mrb[5].mxu1 }
 0x16b   : > { %v633_v21 = vpop.f32.mrb[6].mxu0  ;;  %v728_v22 = vpop.f32.mrb[6].mxu1 }
 0x16c   : > { %1117 = vst [vmem:[%s2179_s5 + $0x28] sm:$0xff] %v633_v21  ;;  %v1469_v23 = vpop.f32.mrb[7].mxu0  ;;  %1119 = vst [vmem:[%s2179_s5 + $0x38] sm:$0xff] %v728_v22  ;;  %v1489_v24 = vpop.f32.mrb[7].mxu1 }
 0x189   : > { %v820_v25 = vpop.f32.mrb[8].mxu0  ;;  %v915_v26 = vpop.f32.mrb[8].mxu1 }
 0x18a   : > { %1120 = vst [vmem:[%s2179_s5 + $0x40] sm:$0xff] %v820_v25  ;;  %v1508_v27 = vpop.f32.mrb[9].mxu0  ;;  %1122 = vst [vmem:[%s2179_s5 + $0x50] sm:$0xff] %v915_v26  ;;  %v1528_v28 = vpop.f32.mrb[9].mxu1 }
 0x18b   : > { %v823_v29 = vpop.f32.mrb[10].mxu0  ;;  %v918_v30 = vpop.f32.mrb[10].mxu1 }
 0x18c   : > { %1121 = vst [vmem:[%s2179_s5 + $0x48] sm:$0xff] %v823_v29  ;;  %v1509_v31 = vpop.f32.mrb[11].mxu0  ;;  %1123 = vst [vmem:[%s2179_s5 + $0x58] sm:$0xff] %v918_v30  ;;  %v1529_v32 = vpop.f32.mrb[11].mxu1 }
 0x1a9   : > { %v1010_v33 = vpop.f32.mrb[12].mxu0  ;;  %v1105_v34 = vpop.f32.mrb[12].mxu1 }
 0x1aa   : > { %1124 = vst [vmem:[%s2179_s5 + $0x60] sm:$0xff] %v1010_v33  ;;  %v1548_v35 = vpop.f32.mrb[13].mxu0  ;;  %1126 = vst [vmem:[%s2179_s5 + $0x70] sm:$0xff] %v1105_v34  ;;  %v1568_v36 = vpop.f32.mrb[13].mxu1 }
 0x1ab   : > { %v1013_v37 = vpop.f32.mrb[14].mxu0  ;;  %v1108_v38 = vpop.f32.mrb[14].mxu1 }
 0x1ac   : > { %1125 = vst [vmem:[%s2179_s5 + $0x68] sm:$0xff] %v1013_v37  ;;  %v1549_v39 = vpop.f32.mrb[15].mxu0  ;;  %1127 = vst [vmem:[%s2179_s5 + $0x78] sm:$0xff] %v1108_v38  ;;  %v1569_v40 = vpop.f32.mrb[15].mxu1 }
 0x1ad   : > { %1772 = shalt.err (!%p1769_p11)
}
 0x1ae   : > { %s1773_s16 = scalar_lea.hbm %s2199_s25, 2048  ;;  %s1777_s3 = scalar_lea.hbm %s2249_s2, 8192 }
 0x1af   : > { %p1774_p7 = scmp.ne.s32.totalorder %s2199_s25, %s1773_s16  ;;  %p1778_p1 = scmp.lt.u32.totalorder %s2199_s25, %s2249_s2 }
 0x1b0   : > { %p1779_p3 = scmp.lt.u32.totalorder %s1777_s3, %s1773_s16  ;;  %p1781_p12 = scmp.lt.u32.totalorder %s1773_s16, %s2199_s25 }
 0x1b1   : > { %p1775_p8 = pnand %p1774_p7, %p2259_p0 }
 0x1b2   : > { %p1780_p6 = por %p1779_p3, %p1778_p1 }
 0x1b3   : > { %p1776_p13 = pneg %p1775_p8 }
 0x1b4   : > { %p1782_p2 = por %p1781_p12, %p1780_p6 }
 0x1b6   : > { %p1783_p9 = pnand %p1782_p2, %p1776_p13 }
 0x1b8   : > { %1786 = shalt.err (!%p1783_p9)
}
 0x1b9   : > { %s1838_s27 = smov 128   ;;  %s1839_s20 = smov 8  }
 0x1ba   : > { %1574 = dma.vmem_to_hbm [thread:$0]  (%p2259_p0), %s2201_s17, 2048, %s2199_s25, %s1129_s13, %s1838_s27, %s1838_s27, %s1839_s20  }
 0x1bb PF: > { %p1588_p4 = scmp.ge.s32.totalorder %s1829_s12, 2  ;;  %s1158_s5 = sand.u32 1, %s1817_s9  }
 0x1bc   : > { %p2260_p5 = scmp.ne.s32.totalorder %s2255_s22, 0  ;;  %s1159_s8 = scalar_lea.sflag [#allocation4], %s1158_s5 }
 0x1be   : > { %p1584_p10 = pnand %p1588_p4, %p2260_p5 }
 0x1c0   : > { %1812 = dma.done.wait (!%p1584_p10), %s1159_s8, 2048  }
 0x1c1   : > { %1814 = vsyncadd (!%p1584_p10), %s1159_s8, 4294965248  ;;  %p18_p11 = scmp.ge.s32.totalorder %s1880_s15, 6   ;;  %s2261_s9 = smov %s1821_s10 }
 0x1c2   : > { %s2262_s10 = smov %s1825_s11  ;;  %s2263_s11 = smov %s1892_s18 }
 0x1c3   : > { %s2264_s12 = smov %s1880_s15  ;;  %20 = sbr.rel (!%p18_p11) target bundleno = 7 (0x7), region = 86 }
 0x1ca   :  { %1164 = vsyncpa [#allocation3], 1 }
 0x1cb   :  { %1166 = vsyncpa [#allocation3 + $0x1], 1 }
 0x1cc   :  { %1167 = vsyncpa [#allocation6], 1 }
 0x1cd   :  { %1169 = vsyncpa [#allocation6 + $0x1], 1 }
 0x1ce   :  { %1170 = vsyncpa [#allocation4], 1 }
 0x1cf   :  { %1172 = vsyncpa [#allocation4 + $0x1], 1 }

// kernel: reverse.0
= control target key start
LH: loop header
LB: loop body
LE: loop exit
PB: predicated region body
PF: predicated region fallthrough
CT: control target
= control target key end

     0   :  { %v103_v3 = vlaneseq  ;;  %v96_v18 = vld [vmem:[#allocation0 + $0x7] ss:$-1 sm:$0xff]  ;;  %v110_v19 = vld [vmem:[#allocation0 + $0x17] ss:$-1 sm:$0xff]  ;;  %s604_s0 = inlined_call_operand.vmem [shape: f32[2,8,16,7], index: 0, kind: input, shape index: {}]   ;;  %s605_s1 = inlined_call_operand.vmem [shape: f32[2,8,16,7], index: 1, kind: output, shape index: {}]  }
   0x1   :  { %v60_v0 = vld [vmem:[%s604_s0] sm:$0xff]  ;;  %v62_v1 = vld [vmem:[%s604_s0 + $0x8] sm:$0xff]  ;;  %v64_v2 = vld [vmem:[%s604_s0 + $0x10] sm:$0xff]  ;;  %v97_v20 = vrot.slane %v96_v18, 1  ;;  %v111_v21 = vrot.slane %v110_v19, 1 }
   0x2   :  { %61 = vst [vmem:[#allocation0 + $0x8] sm:$0xff] %v60_v0  ;;  %63 = vst [vmem:[#allocation0 + $0x18] sm:$0xff] %v62_v1  ;;  %v66_v4 = vld [vmem:[%s604_s0 + $0x18] sm:$0xff]  ;;  %v68_v5 = vld [vmem:[%s604_s0 + $0x20] sm:$0xff]  ;;  %v500_v10 = vshrl.u32 %v103_v3, 7 }
   0x3   :  { %65 = vst [vmem:[#allocation0 + $0x28] sm:$0xff] %v64_v2  ;;  %v70_v6 = vld [vmem:[%s604_s0 + $0x28] sm:$0xff]  ;;  %67 = vst [vmem:[#allocation0 + $0x38] sm:$0xff] %v66_v4  ;;  %v72_v7 = vld [vmem:[%s604_s0 + $0x30] sm:$0xff] }
   0x4   :  { %69 = vst [vmem:[#allocation0 + $0x48] sm:$0xff] %v68_v5  ;;  %71 = vst [vmem:[#allocation0 + $0x58] sm:$0xff] %v70_v6  ;;  %v74_v8 = vld [vmem:[%s604_s0 + $0x38] sm:$0xff]  ;;  %v76_v9 = vld [vmem:[%s604_s0 + $0x40] sm:$0xff]  ;;  %vm105_vm0 = vcmp.lt.s32.totalorder %v500_v10, 7 }
   0x5   :  { %73 = vst [vmem:[#allocation0 + $0x68] sm:$0xff] %v72_v7  ;;  %75 = vst [vmem:[#allocation0 + $0x78] sm:$0xff] %v74_v8  ;;  %v78_v11 = vld [vmem:[%s604_s0 + $0x48] sm:$0xff]  ;;  %v80_v12 = vld [vmem:[%s604_s0 + $0x50] sm:$0xff] }
   0x6   :  { %77 = vst [vmem:[#allocation0 + $0x88] sm:$0xff] %v76_v9  ;;  %v82_v13 = vld [vmem:[%s604_s0 + $0x58] sm:$0xff]  ;;  %79 = vst [vmem:[#allocation0 + $0x98] sm:$0xff] %v78_v11  ;;  %v84_v14 = vld [vmem:[%s604_s0 + $0x60] sm:$0xff] }
   0x7   :  { %81 = vst [vmem:[#allocation0 + $0xa8] sm:$0xff] %v80_v12  ;;  %83 = vst [vmem:[#allocation0 + $0xb8] sm:$0xff] %v82_v13  ;;  %v86_v15 = vld [vmem:[%s604_s0 + $0x68] sm:$0xff]  ;;  %v88_v16 = vld [vmem:[%s604_s0 + $0x70] sm:$0xff] }
   0x8   :  { %85 = vst [vmem:[#allocation0 + $0xc8] sm:$0xff] %v84_v14  ;;  %87 = vst [vmem:[#allocation0 + $0xd8] sm:$0xff] %v86_v15  ;;  %v90_v17 = vld [vmem:[%s604_s0 + $0x78] sm:$0xff]  ;;  %v124_v22 = vld [vmem:[#allocation0 + $0x27] ss:$-1 sm:$0xff] }
   0x9   :  { %89 = vst [vmem:[#allocation0 + $0xe8] sm:$0xff] %v88_v16  ;;  %91 = vst [vmem:[#allocation0 + $0xf8] sm:$0xff] %v90_v17  ;;  %v138_v23 = vld [vmem:[#allocation0 + $0x37] ss:$-1 sm:$0xff]  ;;  %v125_v24 = vrot.slane %v124_v22, 1 }
   0xa   :  { %v139_v25 = vrot.slane %v138_v23, 1  ;;  %v152_v26 = vld [vmem:[#allocation0 + $0x47] ss:$-1 sm:$0xff]  ;;  %v166_v27 = vld [vmem:[#allocation0 + $0x57] ss:$-1 sm:$0xff]  ;;  %98 = vst [vmem:[#allocation1] sm:$0xff] %v97_v20 }
   0xb   :  { %v101_v28 = vld [vmem:[#allocation0 + $0xf] ss:$-1 sm:$0xff]  ;;  %112 = vst [vmem:[#allocation1 + $0x8] sm:$0xff] %v111_v21  ;;  %v115_v29 = vld [vmem:[#allocation0 + $0x1f] ss:$-1 sm:$0xff]  ;;  %126 = vst [vmem:[#allocation1 + $0x10] sm:$0xff] %v125_v24 }
   0xc   :  { %v129_v30 = vld [vmem:[#allocation0 + $0x2f] ss:$-1 sm:$0xff]  ;;  %v102_v31 = vrot.slane %v101_v28, 1  ;;  %v116_v32 = vrot.slane %v115_v29, 1  ;;  %140 = vst [vmem:[#allocation1 + $0x18] sm:$0xff] %v139_v25  ;;  %v153_v35 = vrot.slane %v152_v26, 1 }
   0xd   :  { %v130_v33 = vrot.slane %v129_v30, 1  ;;  %v143_v34 = vld [vmem:[#allocation0 + $0x3f] ss:$-1 sm:$0xff]  ;;  %v157_v37 = vld [vmem:[#allocation0 + $0x4f] ss:$-1 sm:$0xff]  ;;  %v167_v38 = vrot.slane %v166_v27, 1 }
   0xe   :  { %v144_v36 = vrot.slane %v143_v34, 1  ;;  %v171_v39 = vld [vmem:[#allocation0 + $0x5f] ss:$-1 sm:$0xff]  ;;  %106 = vst.msk [vmem:[#allocation1] sm:$0xff] %vm105_vm0, %v102_v31  ;;  %120 = vst.msk [vmem:[#allocation1 + $0x8] sm:$0xff] %vm105_vm0, %v116_v32  ;;  %v158_v40 = vrot.slane %v157_v37, 1 }
   0xf   :  { %134 = vst.msk [vmem:[#allocation1 + $0x10] sm:$0xff] %vm105_vm0, %v130_v33  ;;  %154 = vst [vmem:[#allocation1 + $0x20] sm:$0xff] %v153_v35  ;;  %v172_v41 = vrot.slane %v171_v39, 1  ;;  %v180_v42 = vld [vmem:[#allocation0 + $0x67] ss:$-1 sm:$0xff] }
  0x10   :  { %v185_v43 = vld [vmem:[#allocation0 + $0x6f] ss:$-1 sm:$0xff]  ;;  %148 = vst.msk [vmem:[#allocation1 + $0x18] sm:$0xff] %vm105_vm0, %v144_v36  ;;  %168 = vst [vmem:[#allocation1 + $0x28] sm:$0xff] %v167_v38  ;;  %v181_v44 = vrot.slane %v180_v42, 1 }
  0x11   :  { %v186_v45 = vrot.slane %v185_v43, 1  ;;  %v194_v46 = vld [vmem:[#allocation0 + $0x77] ss:$-1 sm:$0xff]  ;;  %v199_v47 = vld [vmem:[#allocation0 + $0x7f] ss:$-1 sm:$0xff]  ;;  %162 = vst.msk [vmem:[#allocation1 + $0x20] sm:$0xff] %vm105_vm0, %v158_v40 }
  0x12   :  { %176 = vst.msk [vmem:[#allocation1 + $0x28] sm:$0xff] %vm105_vm0, %v172_v41  ;;  %v195_v48 = vrot.slane %v194_v46, 1  ;;  %v200_v49 = vrot.slane %v199_v47, 1  ;;  %v208_v50 = vld [vmem:[#allocation0 + $0x87] ss:$-1 sm:$0xff]  ;;  %182 = vst [vmem:[#allocation1 + $0x30] sm:$0xff] %v181_v44 }
  0x13   :  { %v213_v51 = vld [vmem:[#allocation0 + $0x8f] ss:$-1 sm:$0xff]  ;;  %v209_v52 = vrot.slane %v208_v50, 1  ;;  %v222_v54 = vld [vmem:[#allocation0 + $0x97] ss:$-1 sm:$0xff]  ;;  %190 = vst.msk [vmem:[#allocation1 + $0x30] sm:$0xff] %vm105_vm0, %v186_v45 }
  0x14   :  { %v214_v53 = vrot.slane %v213_v51, 1  ;;  %v227_v55 = vld [vmem:[#allocation0 + $0x9f] ss:$-1 sm:$0xff]  ;;  %196 = vst [vmem:[#allocation1 + $0x38] sm:$0xff] %v195_v48  ;;  %v223_v56 = vrot.slane %v222_v54, 1 }
  0x15   :  { %v228_v57 = vrot.slane %v227_v55, 1  ;;  %v236_v58 = vld [vmem:[#allocation0 + $0xa7] ss:$-1 sm:$0xff]  ;;  %v241_v59 = vld [vmem:[#allocation0 + $0xaf] ss:$-1 sm:$0xff]  ;;  %204 = vst.msk [vmem:[#allocation1 + $0x38] sm:$0xff] %vm105_vm0, %v200_v49 }
  0x16   :  { %210 = vst [vmem:[#allocation1 + $0x40] sm:$0xff] %v209_v52  ;;  %v237_v60 = vrot.slane %v236_v58, 1  ;;  %v242_v61 = vrot.slane %v241_v59, 1  ;;  %v250_v62 = vld [vmem:[#allocation0 + $0xb7] ss:$-1 sm:$0xff]  ;;  %224 = vst [vmem:[#allocation1 + $0x48] sm:$0xff] %v223_v56 }
  0x17   :  { %v255_v63 = vld [vmem:[#allocation0 + $0xbf] ss:$-1 sm:$0xff]  ;;  %218 = vst.msk [vmem:[#allocation1 + $0x40] sm:$0xff] %vm105_vm0, %v214_v53  ;;  %v251_v0 = vrot.slane %v250_v62, 1  ;;  %v264_v2 = vld [vmem:[#allocation0 + $0xc7] ss:$-1 sm:$0xff] }
  0x18   :  { %v256_v1 = vrot.slane %v255_v63, 1  ;;  %v269_v3 = vld [vmem:[#allocation0 + $0xcf] ss:$-1 sm:$0xff]  ;;  %232 = vst.msk [vmem:[#allocation1 + $0x48] sm:$0xff] %vm105_vm0, %v228_v57  ;;  %238 = vst [vmem:[#allocation1 + $0x50] sm:$0xff] %v237_v60  ;;  %v265_v4 = vrot.slane %v264_v2, 1 }
  0x19   :  { %v270_v5 = vrot.slane %v269_v3, 1  ;;  %v278_v6 = vld [vmem:[#allocation0 + $0xd7] ss:$-1 sm:$0xff]  ;;  %v283_v7 = vld [vmem:[#allocation0 + $0xdf] ss:$-1 sm:$0xff]  ;;  %246 = vst.msk [vmem:[#allocation1 + $0x50] sm:$0xff] %vm105_vm0, %v242_v61 }
  0x1a   :  { %252 = vst [vmem:[#allocation1 + $0x58] sm:$0xff] %v251_v0  ;;  %v279_v8 = vrot.slane %v278_v6, 1  ;;  %v284_v9 = vrot.slane %v283_v7, 1  ;;  %v292_v11 = vld [vmem:[#allocation0 + $0xe7] ss:$-1 sm:$0xff]  ;;  %266 = vst [vmem:[#allocation1 + $0x60] sm:$0xff] %v265_v4 }
  0x1b   :  { %v297_v12 = vld [vmem:[#allocation0 + $0xef] ss:$-1 sm:$0xff]  ;;  %260 = vst.msk [vmem:[#allocation1 + $0x58] sm:$0xff] %vm105_vm0, %v256_v1  ;;  %v293_v13 = vrot.slane %v292_v11, 1  ;;  %v306_v15 = vld [vmem:[#allocation0 + $0xf7] ss:$-1 sm:$0xff] }
  0x1c   :  { %v298_v14 = vrot.slane %v297_v12, 1  ;;  %v311_v16 = vld [vmem:[#allocation0 + $0xff] ss:$-1 sm:$0xff]  ;;  %274 = vst.msk [vmem:[#allocation1 + $0x60] sm:$0xff] %vm105_vm0, %v270_v5  ;;  %280 = vst [vmem:[#allocation1 + $0x68] sm:$0xff] %v279_v8  ;;  %v307_v17 = vrot.slane %v306_v15, 1 }
  0x1d   :  { %v312_v18 = vrot.slane %v311_v16, 1  ;;  %v374_v19 = vld [vmem:[#allocation1] sm:$0xff]  ;;  %v376_v20 = vld [vmem:[#allocation1 + $0x8] sm:$0xff]  ;;  %v378_v21 = vld [vmem:[#allocation1 + $0x10] sm:$0xff]  ;;  %288 = vst.msk [vmem:[#allocation1 + $0x68] sm:$0xff] %vm105_vm0, %v284_v9 }
  0x1e   :  { %294 = vst [vmem:[#allocation1 + $0x70] sm:$0xff] %v293_v13  ;;  %375 = vst [vmem:[%s605_s1] sm:$0xff] %v374_v19  ;;  %v380_v22 = vld [vmem:[#allocation1 + $0x18] sm:$0xff]  ;;  %v382_v23 = vld [vmem:[#allocation1 + $0x20] sm:$0xff] }
  0x1f   :  { %377 = vst [vmem:[%s605_s1 + $0x8] sm:$0xff] %v376_v20  ;;  %379 = vst [vmem:[%s605_s1 + $0x10] sm:$0xff] %v378_v21  ;;  %v384_v24 = vld [vmem:[#allocation1 + $0x28] sm:$0xff]  ;;  %v386_v25 = vld [vmem:[#allocation1 + $0x30] sm:$0xff] }
  0x20   :  { %302 = vst.msk [vmem:[#allocation1 + $0x70] sm:$0xff] %vm105_vm0, %v298_v14  ;;  %308 = vst [vmem:[#allocation1 + $0x78] sm:$0xff] %v307_v17  ;;  %v388_v26 = vld [vmem:[#allocation1 + $0x38] sm:$0xff]  ;;  %v390_v10 = vld [vmem:[#allocation1 + $0x40] sm:$0xff] }
  0x21   :  { %381 = vst [vmem:[%s605_s1 + $0x18] sm:$0xff] %v380_v22  ;;  %383 = vst [vmem:[%s605_s1 + $0x20] sm:$0xff] %v382_v23  ;;  %v392_v27 = vld [vmem:[#allocation1 + $0x48] sm:$0xff]  ;;  %v394_v28 = vld [vmem:[#allocation1 + $0x50] sm:$0xff] }
  0x22   :  { %385 = vst [vmem:[%s605_s1 + $0x28] sm:$0xff] %v384_v24  ;;  %316 = vst.msk [vmem:[#allocation1 + $0x78] sm:$0xff] %vm105_vm0, %v312_v18  ;;  %v396_v29 = vld [vmem:[#allocation1 + $0x58] sm:$0xff] }
  0x23   :  { %387 = vst [vmem:[%s605_s1 + $0x30] sm:$0xff] %v386_v25  ;;  %389 = vst [vmem:[%s605_s1 + $0x38] sm:$0xff] %v388_v26  ;;  %v398_v30 = vld [vmem:[#allocation1 + $0x60] sm:$0xff] }
  0x24   :  { %391 = vst [vmem:[%s605_s1 + $0x40] sm:$0xff] %v390_v10  ;;  %393 = vst [vmem:[%s605_s1 + $0x48] sm:$0xff] %v392_v27  ;;  %v400_v31 = vld [vmem:[#allocation1 + $0x68] sm:$0xff] }
  0x25   :  { %395 = vst [vmem:[%s605_s1 + $0x50] sm:$0xff] %v394_v28  ;;  %397 = vst [vmem:[%s605_s1 + $0x58] sm:$0xff] %v396_v29 }
  0x26   :  { %399 = vst [vmem:[%s605_s1 + $0x60] sm:$0xff] %v398_v30  ;;  %401 = vst [vmem:[%s605_s1 + $0x68] sm:$0xff] %v400_v31 }
  0x27   :  { %v402_v32 = vld [vmem:[#allocation1 + $0x70] sm:$0xff] }
  0x28   :  { %403 = vst [vmem:[%s605_s1 + $0x70] sm:$0xff] %v402_v32 }
  0x29   :  { %v404_v33 = vld [vmem:[#allocation1 + $0x78] sm:$0xff] }
  0x2a   :  { %405 = vst [vmem:[%s605_s1 + $0x78] sm:$0xff] %v404_v33 }

</bundles_post_ra>
